<compile_context>
chip_gen: v7x
topology: tpu7x:2x2x1
jax: 0.10.0
libtpu: 0.0.40
codegen_flags: <defaults>
</compile_context>

<pallas_src>
import jax
import jax.numpy as jnp
from jax.experimental import pallas as pl
from jax.experimental.pallas import tpu as pltpu

NUM_CLASSES = 10
PAD = 128          # lane-padded hidden / class width
NEG_INF = -1e30    # baked into the padded lanes of b2


def _round_up(x, m):
    return (x + m - 1) // m * m


def _mlp_kernel(x_ref, w0_ref, b0_ref, w1_ref, b1_ref, w2_ref, b2_ref, o_ref):
    # x tile streamed in its native dtype; cast to bf16 in-kernel (no extra HBM pass).
    x = x_ref[...].astype(jnp.bfloat16)

    h0 = jnp.dot(x, w0_ref[...], preferred_element_type=jnp.float32) + b0_ref[...]
    h0 = jnp.maximum(h0, 0.0)

    h1 = jnp.dot(h0.astype(jnp.bfloat16), w1_ref[...],
                 preferred_element_type=jnp.float32) + b1_ref[...]
    h1 = jnp.maximum(h1, 0.0)

    # b2 carries -1e30 in the padded class lanes, so no iota/where is needed:
    # those lanes underflow to 0 in the exp and never affect the max or LSE.
    logits = jnp.dot(h1.astype(jnp.bfloat16), w2_ref[...],
                     preferred_element_type=jnp.float32) + b2_ref[...]

    m = jnp.max(logits, axis=1, keepdims=True)
    shifted = logits - m
    lse = jnp.log(jnp.sum(jnp.exp(shifted), axis=1, keepdims=True))
    out = shifted - lse                                   # (TB, 128) f32

    # Single narrow store of the true 10 classes (don't pad HBM writeback).
    o_ref[...] = out[:, :NUM_CLASSES].astype(o_ref.dtype)


def model_a_forward(x, params, *, tb=2048):
    """x: any shape whose trailing dims flatten to image_size (like torch .view).
    params: already-padded weights in bf16, biases in f32 (see init/cast helpers)."""
    w0, b0, w1, b1, w2, b2 = params            # (D,128) bf16, (1,128) f32, ...
    D = w0.shape[0]

    x2d = x.reshape(-1, D)                     # streamed in native dtype
    B = x2d.shape[0]

    # Batch tile: large enough to amortize per-step overhead, capped so the grid
    # has >=2 steps when possible (v7x dual-TC sharding of the "parallel" axis).
    TB = max(8, min(tb, _round_up(pl.cdiv(B, 2), 8)))
    grid = (pl.cdiv(B, TB),)                   # partial last block handled by Pallas
    const2 = lambda i: (0, 0)                  # weights/biases resident across the grid

    flops = 2 * B * (D * PAD + PAD * PAD + PAD * PAD)
    bytes_accessed = (x2d.size * x2d.dtype.itemsize
                      + (w0.size + w1.size + w2.size) * 2
                      + (b0.size + b1.size + b2.size) * 4
                      + B * NUM_CLASSES * 4)
    cost = pl.CostEstimate(flops=flops,
                           transcendentals=B * PAD,
                           bytes_accessed=bytes_accessed)

    out = pl.pallas_call(
        _mlp_kernel,
        out_shape=jax.ShapeDtypeStruct((B, NUM_CLASSES), jnp.float32),
        grid=grid,
        in_specs=[
            pl.BlockSpec((TB, D), lambda i: (i, 0)),      # streamed x tile
            pl.BlockSpec((D, PAD), const2),               # w0 (resident)
            pl.BlockSpec((1, PAD), const2),               # b0
            pl.BlockSpec((PAD, PAD), const2),             # w1
            pl.BlockSpec((1, PAD), const2),               # b1
            pl.BlockSpec((PAD, PAD), const2),             # w2
            pl.BlockSpec((1, PAD), const2),               # b2
        ],
        out_specs=pl.BlockSpec((TB, NUM_CLASSES), lambda i: (i, 0)),
        compiler_params=pltpu.CompilerParams(
            dimension_semantics=("parallel",)),           # v7x dual-TC sharding
        cost_estimate=cost,
    )(x2d, w0, b0, w1, b1, w2, b2)

    return out


def init_params(key, image_size):
    """PyTorch nn.Linear-style init (uniform +-1/sqrt(fan_in)), stored as
    (in_features, out_features) in f32, zero-padded to 128-lane feature dims.
    The padded class lanes of b2 hold -1e30 (the in-kernel mask, baked in)."""
    true_dims = [(image_size, 100), (100, 50), (50, 10)]
    params = []
    for i, (fan_in, fan_out) in enumerate(true_dims):
        kw, kb = jax.random.split(jax.random.fold_in(key, i))
        bound = 1.0 / (fan_in ** 0.5)
        w = jax.random.uniform(kw, (fan_in, fan_out), jnp.float32, -bound, bound)
        b = jax.random.uniform(kb, (1, fan_out), jnp.float32, -bound, bound)
        pad_in = image_size if i == 0 else PAD
        w_p = jnp.zeros((pad_in, PAD), jnp.float32).at[:fan_in, :fan_out].set(w)
        b_p = jnp.zeros((1, PAD), jnp.float32).at[:, :fan_out].set(b)
        if i == 2:
            b_p = b_p.at[:, fan_out:].set(NEG_INF)   # bake the class-padding mask
        params += [w_p, b_p]
    return tuple(params)


def cast_params_for_kernel(params_f32):
    """One-time cast: weights -> bf16 (MXU operands), biases stay f32."""
    w0, b0, w1, b1, w2, b2 = params_f32
    return (w0.astype(jnp.bfloat16), b0,
            w1.astype(jnp.bfloat16), b1,
            w2.astype(jnp.bfloat16), b2)


def _reference_forward_bf16(x, params_bf16):
    """Pure-JAX reference with the same bf16-in / f32-accumulate recipe."""
    w0, b0, w1, b1, w2, b2 = params_bf16
    D = w0.shape[0]
    xb = x.reshape(-1, D).astype(jnp.bfloat16)
    h0 = jnp.maximum(jnp.dot(xb, w0, preferred_element_type=jnp.float32) + b0, 0.0)
    h1 = jnp.maximum(jnp.dot(h0.astype(jnp.bfloat16), w1,
                             preferred_element_type=jnp.float32) + b1, 0.0)
    logits = (jnp.dot(h1.astype(jnp.bfloat16), w2,
                      preferred_element_type=jnp.float32) + b2)[:, :NUM_CLASSES]
    return jax.nn.log_softmax(logits, axis=1)


def _reference_forward_f32(x, params_f32):
    """Full-precision reference of the original ModelA math (padding is inert)."""
    w0, b0, w1, b1, w2, b2 = params_f32
    D = w0.shape[0]
    x2d = x.reshape(-1, D).astype(jnp.float32)
    h0 = jnp.maximum(x2d @ w0 + b0, 0.0)
    h1 = jnp.maximum(h0 @ w1 + b1, 0.0)
    logits = (h1 @ w2 + b2)[:, :NUM_CLASSES]
    return jax.nn.log_softmax(logits, axis=1)


if __name__ == "__main__":
    key = jax.random.PRNGKey(0)
    # small "image" input consistent with the module: 1x16x16 -> image_size=256
    C, H, W = 1, 16, 16
    image_size = C * H * W

    kx, kx2, kp = jax.random.split(key, 3)
    params_f32 = init_params(kp, image_size)
    params = cast_params_for_kernel(params_f32)   # one-time bf16 weight cast

    # Test 1: even batch (single full tile).
    B = 8
    x = jax.random.normal(kx, (B, C, H, W), jnp.float32)
    out = jax.block_until_ready(model_a_forward(x, params))
    assert out.shape == (B, NUM_CLASSES), out.shape
    assert jnp.allclose(out, _reference_forward_bf16(x, params), atol=1e-3, rtol=1e-3), \
        "mismatch vs bf16 reference"
    assert jnp.allclose(out, _reference_forward_f32(x, params_f32), atol=5e-2, rtol=5e-2), \
        "mismatch vs f32 reference"

    # Test 2: irregular batch (multi-step grid + partial last block).
    B2 = 37
    x2 = jax.random.normal(kx2, (B2, C, H, W), jnp.float32)
    out2 = jax.block_until_ready(model_a_forward(x2, params))
    assert out2.shape == (B2, NUM_CLASSES), out2.shape
    assert jnp.allclose(out2, _reference_forward_bf16(x2, params), atol=1e-3, rtol=1e-3), \
        "mismatch vs bf16 reference (irregular batch)"
    assert jnp.allclose(out2, _reference_forward_f32(x2, params_f32), atol=5e-2, rtol=5e-2), \
        "mismatch vs f32 reference (irregular batch)"

    print("KERNEL_OK")
</pallas_src>

<mosaic_0001>
module attributes {stable_mosaic.version = 11 : i64} {
  func.func @_mlp_kernel(%arg0: i32, %arg1: memref<8x256xf32, #tpu.memory_space<vmem>>, %arg2: memref<256x128xbf16, #tpu.memory_space<vmem>>, %arg3: memref<1x128xf32, #tpu.memory_space<vmem>>, %arg4: memref<128x128xbf16, #tpu.memory_space<vmem>>, %arg5: memref<1x128xf32, #tpu.memory_space<vmem>>, %arg6: memref<128x128xbf16, #tpu.memory_space<vmem>>, %arg7: memref<1x128xf32, #tpu.memory_space<vmem>>, %arg8: memref<8x10xf32, #tpu.memory_space<vmem>>) attributes {dimension_semantics = [#tpu.dimension_semantics<parallel>], iteration_bounds = array<i64: 1>, scalar_prefetch = 0 : i64, scratch_operands = 0 : i64, tpu.core_type = #tpu.core_type<tc>, window_params = [{transform_indices = @transform_0, window_bounds = array<i64: 8, 256>}, {pipeline_mode = #tpu.pipeline_mode<synchronous>, transform_indices = @transform_1, window_bounds = array<i64: 256, 128>}, {pipeline_mode = #tpu.pipeline_mode<synchronous>, transform_indices = @transform_2, window_bounds = array<i64: 1, 128>}, {pipeline_mode = #tpu.pipeline_mode<synchronous>, transform_indices = @transform_3, window_bounds = array<i64: 128, 128>}, {pipeline_mode = #tpu.pipeline_mode<synchronous>, transform_indices = @transform_4, window_bounds = array<i64: 1, 128>}, {pipeline_mode = #tpu.pipeline_mode<synchronous>, transform_indices = @transform_5, window_bounds = array<i64: 128, 128>}, {pipeline_mode = #tpu.pipeline_mode<synchronous>, transform_indices = @transform_6, window_bounds = array<i64: 1, 128>}, {transform_indices = @transform_7, window_bounds = array<i64: 8, 10>}]} {
    %c0 = arith.constant 0 : index
    %c0_0 = arith.constant 0 : index
    %0 = vector.load %arg1[%c0, %c0_0] : memref<8x256xf32, #tpu.memory_space<vmem>>, vector<8x256xf32>
    %1 = arith.truncf %0 : vector<8x256xf32> to vector<8x256xbf16>
    %c0_1 = arith.constant 0 : index
    %c0_2 = arith.constant 0 : index
    %2 = vector.load %arg2[%c0_1, %c0_2] : memref<256x128xbf16, #tpu.memory_space<vmem>>, vector<256x128xbf16>
    %cst = arith.constant dense<0.000000e+00> : vector<8x128xf32>
    %3 = tpu.matmul %1, %2, %cst {dimension_numbers = #tpu.dot_dimension_numbers<[1], [0], [0], [1], [0, 0, 1, 1], [], []>} : vector<8x256xbf16>, vector<256x128xbf16>, vector<8x128xf32> -> vector<8x128xf32>
    %c0_3 = arith.constant 0 : index
    %c0_4 = arith.constant 0 : index
    %4 = vector.load %arg3[%c0_3, %c0_4] : memref<1x128xf32, #tpu.memory_space<vmem>>, vector<1x128xf32>
    %5 = vector.broadcast %4 : vector<1x128xf32> to vector<8x128xf32>
    %6 = arith.addf %3, %5 : vector<8x128xf32>
    %cst_5 = arith.constant 0.000000e+00 : f32
    %7 = vector.broadcast %cst_5 : f32 to vector<8x128xf32>
    %8 = arith.maximumf %6, %7 : vector<8x128xf32>
    %9 = arith.truncf %8 : vector<8x128xf32> to vector<8x128xbf16>
    %c0_6 = arith.constant 0 : index
    %c0_7 = arith.constant 0 : index
    %10 = vector.load %arg4[%c0_6, %c0_7] : memref<128x128xbf16, #tpu.memory_space<vmem>>, vector<128x128xbf16>
    %cst_8 = arith.constant dense<0.000000e+00> : vector<8x128xf32>
    %11 = tpu.matmul %9, %10, %cst_8 {dimension_numbers = #tpu.dot_dimension_numbers<[1], [0], [0], [1], [0, 0, 1, 1], [], []>} : vector<8x128xbf16>, vector<128x128xbf16>, vector<8x128xf32> -> vector<8x128xf32>
    %c0_9 = arith.constant 0 : index
    %c0_10 = arith.constant 0 : index
    %12 = vector.load %arg5[%c0_9, %c0_10] : memref<1x128xf32, #tpu.memory_space<vmem>>, vector<1x128xf32>
    %13 = vector.broadcast %12 : vector<1x128xf32> to vector<8x128xf32>
    %14 = arith.addf %11, %13 : vector<8x128xf32>
    %cst_11 = arith.constant 0.000000e+00 : f32
    %15 = vector.broadcast %cst_11 : f32 to vector<8x128xf32>
    %16 = arith.maximumf %14, %15 : vector<8x128xf32>
    %17 = arith.truncf %16 : vector<8x128xf32> to vector<8x128xbf16>
    %c0_12 = arith.constant 0 : index
    %c0_13 = arith.constant 0 : index
    %18 = vector.load %arg6[%c0_12, %c0_13] : memref<128x128xbf16, #tpu.memory_space<vmem>>, vector<128x128xbf16>
    %cst_14 = arith.constant dense<0.000000e+00> : vector<8x128xf32>
    %19 = tpu.matmul %17, %18, %cst_14 {dimension_numbers = #tpu.dot_dimension_numbers<[1], [0], [0], [1], [0, 0, 1, 1], [], []>} : vector<8x128xbf16>, vector<128x128xbf16>, vector<8x128xf32> -> vector<8x128xf32>
    %c0_15 = arith.constant 0 : index
    %c0_16 = arith.constant 0 : index
    %20 = vector.load %arg7[%c0_15, %c0_16] : memref<1x128xf32, #tpu.memory_space<vmem>>, vector<1x128xf32>
    %21 = vector.broadcast %20 : vector<1x128xf32> to vector<8x128xf32>
    %22 = arith.addf %19, %21 : vector<8x128xf32>
    %cst_17 = arith.constant dense<0xFF800000> : vector<8xf32>
    %23 = vector.multi_reduction <maximumf>, %22, %cst_17 [1] : vector<8x128xf32> to vector<8xf32>
    %24 = vector.shape_cast %23 : vector<8xf32> to vector<8x1xf32>
    %25 = vector.broadcast %24 : vector<8x1xf32> to vector<8x128xf32>
    %26 = arith.subf %22, %25 : vector<8x128xf32>
    %27 = math.exp %26 : vector<8x128xf32>
    %cst_18 = arith.constant dense<0.000000e+00> : vector<8xf32>
    %28 = vector.multi_reduction <add>, %27, %cst_18 [1] : vector<8x128xf32> to vector<8xf32>
    %29 = vector.shape_cast %28 : vector<8xf32> to vector<8x1xf32>
    %30 = math.log %29 : vector<8x1xf32>
    %31 = vector.broadcast %30 : vector<8x1xf32> to vector<8x128xf32>
    %32 = arith.subf %26, %31 : vector<8x128xf32>
    %33 = vector.extract_strided_slice %32 {offsets = [0, 0], sizes = [8, 10], strides = [1, 1]} : vector<8x128xf32> to vector<8x10xf32>
    %c0_19 = arith.constant 0 : index
    %c0_20 = arith.constant 0 : index
    %34 = vector.load %arg8[%c0_19, %c0_20] : memref<8x10xf32, #tpu.memory_space<vmem>>, vector<8x10xf32>
    tpu.vector_store %arg8[%c0_19, %c0_20], %33 {strides = array<i32>} : memref<8x10xf32, #tpu.memory_space<vmem>>, vector<8x10xf32>,
    return
  }
  func.func @transform_0(%arg0: i32) -> (i32, i32) {
    %c0_i32 = arith.constant 0 : i32
    %c0_i32_0 = arith.constant 0 : i32
    return %arg0, %c0_i32 : i32, i32
  }
  func.func @transform_1(%arg0: i32) -> (i32, i32) {
    %c0_i32 = arith.constant 0 : i32
    %c0_i32_0 = arith.constant 0 : i32
    %c0_i32_1 = arith.constant 0 : i32
    return %c0_i32, %c0_i32_0 : i32, i32
  }
  func.func @transform_2(%arg0: i32) -> (i32, i32) {
    %c0_i32 = arith.constant 0 : i32
    %c0_i32_0 = arith.constant 0 : i32
    %c0_i32_1 = arith.constant 0 : i32
    return %c0_i32, %c0_i32_0 : i32, i32
  }
  func.func @transform_3(%arg0: i32) -> (i32, i32) {
    %c0_i32 = arith.constant 0 : i32
    %c0_i32_0 = arith.constant 0 : i32
    %c0_i32_1 = arith.constant 0 : i32
    return %c0_i32, %c0_i32_0 : i32, i32
  }
  func.func @transform_4(%arg0: i32) -> (i32, i32) {
    %c0_i32 = arith.constant 0 : i32
    %c0_i32_0 = arith.constant 0 : i32
    %c0_i32_1 = arith.constant 0 : i32
    return %c0_i32, %c0_i32_0 : i32, i32
  }
  func.func @transform_5(%arg0: i32) -> (i32, i32) {
    %c0_i32 = arith.constant 0 : i32
    %c0_i32_0 = arith.constant 0 : i32
    %c0_i32_1 = arith.constant 0 : i32
    return %c0_i32, %c0_i32_0 : i32, i32
  }
  func.func @transform_6(%arg0: i32) -> (i32, i32) {
    %c0_i32 = arith.constant 0 : i32
    %c0_i32_0 = arith.constant 0 : i32
    %c0_i32_1 = arith.constant 0 : i32
    return %c0_i32, %c0_i32_0 : i32, i32
  }
  func.func @transform_7(%arg0: i32) -> (i32, i32) {
    %c0_i32 = arith.constant 0 : i32
    %c0_i32_0 = arith.constant 0 : i32
    return %arg0, %c0_i32 : i32, i32
  }
}

</mosaic_0001>

<bundles_post_ra>
// kernel: tpu_custom_call.1
= control target key start
LH: loop header
LB: loop body
LE: loop exit
PB: predicated region body
PF: predicated region fallthrough
CT: control target
= control target key end

     0   :  { %12 = vsyncpa [#allocation3], 0  ;;  %s938_s0 = inlined_call_operand.hbm [shape: f32[8,256], index: 0, kind: input, shape index: {}]   ;;  %s939_s1 = inlined_call_operand.hbm [shape: bf16[256,128], index: 1, kind: input, shape index: {}]   ;;  %s940_s2 = inlined_call_operand.vmem [shape: f32[1,128], index: 2, kind: input, shape index: {}]   ;;  %s941_s3 = inlined_call_operand.hbm [shape: bf16[128,128], index: 3, kind: input, shape index: {}]   ;;  %s942_s4 = inlined_call_operand.vmem [shape: f32[1,128], index: 4, kind: input, shape index: {}]   ;;  %s943_s5 = inlined_call_operand.hbm [shape: bf16[128,128], index: 5, kind: input, shape index: {}]   ;;  %s944_s6 = inlined_call_operand.vmem [shape: f32[1,128], index: 6, kind: input, shape index: {}]   ;;  %s945_s7 = inlined_call_operand.hbm [shape: f32[8,10], index: 7, kind: output, shape index: {}]  }
   0x1   :  { %13 = vsyncpa [#allocation6], 0 }
   0x2   :  { %14 = vsyncpa [#allocation9], 0 }
   0x3   :  { %15 = vsyncpa [#allocation4], 0  ;;  %s793_s24 = smov [#allocation5]   ;;  %s675_s28 = scalar_lea.hbm %s939_s1, 2048 }
   0x4   :  { %s31_s25 = sshll.u32 %s793_s24, 4  ;;  %p676_p0 = scmp.ne.s32.totalorder %s939_s1, %s675_s28  ;;  %s32_s25 = int_to_ptr.vmem [resolvable:$true] %s31_s25 }
   0x5   :  { %p679_p1 = scmp.lt.u32.totalorder %s675_s28, %s939_s1 }
   0x7   :  { %p681_p2 = pnand %p679_p1, %p676_p0 }
   0x9   :  { %684 = shalt.err (!%p681_p2)
}
   0xa   :  { %s685_s10 = scalar_lea.vmem %s32_s25, 2048  ;;  %p690_p4 = scmp.lt.s32.totalorder %s32_s25, %s32_s25 }
   0xb   :  { %p686_p3 = scmp.ne.s32.totalorder %s32_s25, %s685_s10  ;;  %p691_p5 = scmp.lt.s32.totalorder %s685_s10, %s685_s10 }
   0xd   :  { %p692_p6 = por %p691_p5, %p690_p4 }
   0xf   :  { %p693_p7 = pnand %p692_p6, %p686_p3 }
  0x11   :  { %696 = shalt.err (!%p693_p7)
}
  0x12   :  { %s794_s11 = smov 64   ;;  %s795_s12 = smov 4  }
  0x13   :  { %37 = dma.hbm_to_vmem [thread:$0]  %s939_s1, 2048, %s32_s25, [#allocation6], %s794_s11, %s794_s11, %s795_s12  }
  0x14   :  { %s796_s15 = smov [#allocation2]   ;;  %s797_s17 = smov [#allocation7]  }
  0x15   :  { %s22_s16 = sshll.u32 %s796_s15, 4  ;;  %s45_s18 = sshll.u32 %s797_s17, 4  ;;  %s23_s16 = int_to_ptr.vmem [resolvable:$true] %s22_s16  ;;  %s46_s18 = int_to_ptr.vmem [resolvable:$true] %s45_s18 }
  0x16   :  { %s697_s21 = scalar_lea.hbm %s938_s0, 256 }
  0x17   :  { %p698_p8 = scmp.ne.s32.totalorder %s938_s0, %s697_s21  ;;  %p701_p9 = scmp.lt.u32.totalorder %s697_s21, %s938_s0 }
  0x19   :  { %p703_p10 = pnand %p701_p9, %p698_p8 }
  0x1b   :  { %706 = shalt.err (!%p703_p10)
}
  0x1c   :  { %s707_s1 = scalar_lea.vmem %s23_s16, 256  ;;  %p712_p12 = scmp.lt.s32.totalorder %s23_s16, %s23_s16 }
  0x1d   :  { %p708_p11 = scmp.ne.s32.totalorder %s23_s16, %s707_s1  ;;  %p713_p13 = scmp.lt.s32.totalorder %s707_s1, %s707_s1 }
  0x1f   :  { %p714_p0 = por %p713_p13, %p712_p12 }
  0x21   :  { %p715_p1 = pnand %p714_p0, %p708_p11 }
  0x23   :  { %718 = shalt.err (!%p715_p1)
}
  0x24   :  { %25 = dma.hbm_to_vmem [thread:$0]  %s938_s0, 256, %s23_s16, [#allocation3]  }
  0x25   :  { %s719_s30 = scalar_lea.hbm %s941_s3, 1024 }
  0x26   :  { %p720_p2 = scmp.ne.s32.totalorder %s941_s3, %s719_s30  ;;  %p723_p3 = scmp.lt.u32.totalorder %s719_s30, %s941_s3 }
  0x28   :  { %p725_p4 = pnand %p723_p3, %p720_p2 }
  0x2a   :  { %728 = shalt.err (!%p725_p4)
}
  0x2b   :  { %s729_s14 = scalar_lea.vmem %s46_s18, 1024  ;;  %p734_p6 = scmp.lt.s32.totalorder %s46_s18, %s46_s18 }
  0x2c   :  { %p730_p5 = scmp.ne.s32.totalorder %s46_s18, %s729_s14  ;;  %p735_p7 = scmp.lt.s32.totalorder %s729_s14, %s729_s14 }
  0x2e   :  { %p736_p8 = por %p735_p7, %p734_p6 }
  0x30   :  { %p737_p9 = pnand %p736_p8, %p730_p5 }
  0x32   :  { %740 = shalt.err (!%p737_p9)
}
  0x33   :  { %51 = dma.hbm_to_vmem [thread:$0]  %s941_s3, 1024, %s46_s18, [#allocation6], %s794_s11, %s794_s11, %s795_s12  }
  0x34   :  { %s798_s16 = smov [#allocation8]   ;;  %s741_s21 = scalar_lea.hbm %s943_s5, 1024 }
  0x35   :  { %s59_s17 = sshll.u32 %s798_s16, 4  ;;  %p742_p10 = scmp.ne.s32.totalorder %s943_s5, %s741_s21  ;;  %s60_s17 = int_to_ptr.vmem [resolvable:$true] %s59_s17 }
  0x36   :  { %p745_p11 = scmp.lt.u32.totalorder %s741_s21, %s943_s5 }
  0x38   :  { %p747_p12 = pnand %p745_p11, %p742_p10 }
  0x3a   :  { %750 = shalt.err (!%p747_p12)
}
  0x3b   :  { %s751_s1 = scalar_lea.vmem %s60_s17, 1024  ;;  %p756_p0 = scmp.lt.s32.totalorder %s60_s17, %s60_s17 }
  0x3c   :  { %p752_p13 = scmp.ne.s32.totalorder %s60_s17, %s751_s1  ;;  %p757_p1 = scmp.lt.s32.totalorder %s751_s1, %s751_s1 }
  0x3e   :  { %p758_p2 = por %p757_p1, %p756_p0 }
  0x40   :  { %p759_p3 = pnand %p758_p2, %p752_p13 }
  0x42   :  { %762 = shalt.err (!%p759_p3)
}
  0x43   :  { %65 = dma.hbm_to_vmem [thread:$0]  %s943_s5, 1024, %s60_s17, [#allocation9], %s794_s11, %s794_s11, %s795_s12  }
  0x44   :  { %785 = dma.done.wait [#allocation3], 256  }
  0x45   :  { %786 = vsyncadd [#allocation3], 4294967040 }
  0x46   :  { %787 = dma.done.wait [#allocation6], 3072  }
  0x47   :  { %788 = vsyncadd [#allocation6], 4294964224 }
  0x48   :  { %789 = dma.done.wait [#allocation9], 1024  }
  0x49   :  { %790 = vsyncadd [#allocation9], 4294966272  ;;  %v799_v0 = vmov 0.0   ;;  %v639_v1 = vld [vmem:[#allocation5 + $0x40] sm:$0xff]   ;;  %v641_v3 = vld [vmem:[#allocation5 + $0x48] sm:$0xff]   ;;  %vm800_vm0 = vmmov 0  }
  0x4a   :  { %590 = vmatprep.subr.bf16.mxu1 %v799_v0  ;;  %v640_v2 = vld [vmem:[#allocation5] sm:$0xff]   ;;  %550 = vmatprep.subr.bf16.mxu0 %v639_v1  ;;  %v642_v4 = vld [vmem:[#allocation5 + $0x8] sm:$0xff]   ;;  %v643_v5 = vld [vmem:[#allocation5 + $0x50] sm:$0xff]   ;;  %vm496_vm1 = vcmask 80896  }
  0x4b   :  { %551 = vmatpush3.bf16.msra.mxu0 %v640_v2  ;;  %v644_v6 = vld [vmem:[#allocation5 + $0x10] sm:$0xff]   ;;  %v645_v7 = vld [vmem:[#allocation5 + $0x58] sm:$0xff]   ;;  %v647_v9 = vld [vmem:[#allocation5 + $0x60] sm:$0xff]   ;;  %606 = vmatprep.mubr.msk.bf16.mxu1 %vm800_vm0, %v799_v0 }
  0x4c   :  { %552 = vmatprep.subr.bf16.mxu0 %v641_v3  ;;  %v646_v8 = vld [vmem:[#allocation5 + $0x18] sm:$0xff]   ;;  %v648_v10 = vld [vmem:[#allocation5 + $0x20] sm:$0xff]   ;;  %v649_v11 = vld [vmem:[#allocation5 + $0x68] sm:$0xff]  }
  0x4d   :  { %v82_v12 = vld [vmem:[#allocation2 + $0x8] sm:$0xff]  ;;  %v655_v14 = vld [vmem:[#allocation7] sm:$0xff]   ;;  %v650_v15 = vld [vmem:[#allocation5 + $0x28] sm:$0xff]  }
  0x4e   :  { %v84_v13 = vpack.c.bf16 %v82_v12, %v82_v12  ;;  %v651_v16 = vld [vmem:[#allocation5 + $0x70] sm:$0xff]   ;;  %591 = vmatpush3.bf16.msra.mxu1 %v655_v14  ;;  %v656_v17 = vld [vmem:[#allocation7 + $0x8] sm:$0xff]   ;;  %v653_v19 = vld [vmem:[#allocation5 + $0x78] sm:$0xff]  }
  0x4f   :  { %553 = vmatpush3.bf16.msra.mxu0 %v642_v4  ;;  %v652_v18 = vld [vmem:[#allocation5 + $0x30] sm:$0xff]   ;;  %592 = vmatprep.subr.bf16.mxu1 %v799_v0  ;;  %v654_v21 = vld [vmem:[#allocation5 + $0x38] sm:$0xff]   ;;  %v659_v25 = vld [vmem:[#allocation7 + $0x20] sm:$0xff]  }
  0x50   :  { %554 = vmatprep.subr.bf16.mxu0 %v643_v5  ;;  %252 = vmatprep.mubr.bf16.mxu0 %v84_v13  ;;  %v657_v20 = vld [vmem:[#allocation7 + $0x10] sm:$0xff]   ;;  %v658_v23 = vld [vmem:[#allocation7 + $0x18] sm:$0xff]   ;;  %v660_v26 = vld [vmem:[#allocation7 + $0x28] sm:$0xff]  }
  0x51   :  { %v81_v22 = vld [vmem:[#allocation2] sm:$0xff]  ;;  %v662_v28 = vld [vmem:[#allocation7 + $0x38] sm:$0xff]   ;;  %v663_v29 = vld [vmem:[#allocation8] sm:$0xff]  }
  0x52   :  { %593 = vmatpush3.bf16.msra.mxu1 %v656_v17  ;;  %v83_v24 = vpack.c.bf16 %v81_v22, %v81_v22  ;;  %v661_v27 = vld [vmem:[#allocation7 + $0x30] sm:$0xff]   ;;  %v664_v30 = vld [vmem:[#allocation8 + $0x8] sm:$0xff]   ;;  %v666_v32 = vld [vmem:[#allocation8 + $0x18] sm:$0xff]  }
  0x53   :  { %555 = vmatpush3.bf16.msra.mxu0 %v644_v6  ;;  %594 = vmatprep.subr.bf16.mxu1 %v799_v0  ;;  %v665_v31 = vld [vmem:[#allocation8 + $0x10] sm:$0xff]   ;;  %v667_v33 = vld [vmem:[#allocation8 + $0x20] sm:$0xff]   ;;  %v668_v34 = vld [vmem:[#allocation8 + $0x28] sm:$0xff]  }
  0x54   :  { %556 = vmatprep.subr.bf16.mxu0 %v645_v7  ;;  %v515_v36 = vld [vmem:[%s940_s2] ss:$0 sm:$0xff]  ;;  %v670_v45 = vld [vmem:[#allocation8 + $0x38] sm:$0xff]  }
  0x55   :  { %v669_v44 = vld [vmem:[#allocation8 + $0x30] sm:$0xff]  }
  0x56   :  { %595 = vmatpush3.bf16.msra.mxu1 %v657_v20  ;;  %v532_v46 = vld [vmem:[%s942_s4] ss:$0 sm:$0xff]  ;;  %s801_s4 = smov [#allocation10]  }
  0x57   :  { %557 = vmatpush3.bf16.msra.mxu0 %v646_v8  ;;  %596 = vmatprep.subr.bf16.mxu1 %v799_v0  ;;  %v541_v54 = vld [vmem:[%s944_s6] ss:$0 sm:$0xff]  ;;  %s504_s28 = sshll.u32 %s801_s4, 4  ;;  %s505_s28 = int_to_ptr.vmem [resolvable:$true] %s504_s28 }
  0x58   :  { %558 = vmatprep.subr.bf16.mxu0 %v647_v9  ;;  %s763_s6 = scalar_lea.vmem %s505_s28, 128  ;;  %p768_p5 = scmp.lt.s32.totalorder %s505_s28, %s505_s28 }
  0x59   :  { %p764_p4 = scmp.ne.s32.totalorder %s505_s28, %s763_s6  ;;  %p769_p6 = scmp.lt.s32.totalorder %s763_s6, %s763_s6 }
  0x5a   :  { %597 = vmatpush3.bf16.msra.mxu1 %v658_v23 }
  0x5b   :  { %559 = vmatpush3.bf16.msra.mxu0 %v648_v10  ;;  %598 = vmatprep.subr.bf16.mxu1 %v799_v0  ;;  %p770_p7 = por %p769_p6, %p768_p5 }
  0x5c   :  { %560 = vmatprep.subr.bf16.mxu0 %v649_v11 }
  0x5d   :  { %p771_p8 = pnand %p770_p7, %p764_p4 }
  0x5e   :  { %599 = vmatpush3.bf16.msra.mxu1 %v659_v25 }
  0x5f   :  { %561 = vmatpush3.bf16.msra.mxu0 %v650_v15  ;;  %600 = vmatprep.subr.bf16.mxu1 %v799_v0 }
  0x60   :  { %562 = vmatprep.subr.bf16.mxu0 %v651_v16 }
  0x62   :  { %601 = vmatpush3.bf16.msra.mxu1 %v660_v26 }
  0x63   :  { %563 = vmatpush3.bf16.msra.mxu0 %v652_v18  ;;  %602 = vmatprep.subr.bf16.mxu1 %v799_v0 }
  0x64   :  { %564 = vmatprep.subr.bf16.mxu0 %v653_v19 }
  0x66   :  { %603 = vmatpush3.bf16.msra.mxu1 %v661_v27 }
  0x67   :  { %565 = vmatpush3.bf16.msra.mxu0 %v654_v21  ;;  %604 = vmatprep.subr.bf16.mxu1 %v799_v0 }
  0x68   :  { %610 = vmatprep.subr.bf16.mxu0 %v799_v0 }
  0x6a   :  { %253 = vmatmul.mubr.bf16.vlgmr.msra.gmra.mrb[0].mxu0 %v83_v24  ;;  %605 = vmatpush3.bf16.msra.mxu1 %v662_v28 }
  0x6b   :  { %626 = vmatprep.mubr.msk.bf16.mxu0 %vm800_vm0, %v799_v0  ;;  %611 = vmatpush3.bf16.msra.mxu0 %v663_v29 }
  0x6c   :  { %612 = vmatprep.subr.bf16.mxu0 %v799_v0 }
  0x6f   :  { %613 = vmatpush3.bf16.msra.mxu0 %v664_v30 }
  0x70   :  { %614 = vmatprep.subr.bf16.mxu0 %v799_v0 }
  0x73   :  { %615 = vmatpush3.bf16.msra.mxu0 %v665_v31 }
  0x74   :  { %616 = vmatprep.subr.bf16.mxu0 %v799_v0 }
  0x77   :  { %617 = vmatpush3.bf16.msra.mxu0 %v666_v32 }
  0x78   :  { %618 = vmatprep.subr.bf16.mxu0 %v799_v0 }
  0x7b   :  { %619 = vmatpush3.bf16.msra.mxu0 %v667_v33 }
  0x7c   :  { %620 = vmatprep.subr.bf16.mxu0 %v799_v0 }
  0x7f   :  { %621 = vmatpush3.bf16.msra.mxu0 %v668_v34 }
  0x80   :  { %622 = vmatprep.subr.bf16.mxu0 %v799_v0 }
  0x83   :  { %623 = vmatpush3.bf16.msra.mxu0 %v669_v44 }
  0x84   :  { %624 = vmatprep.subr.bf16.mxu0 %v799_v0 }
  0x87   :  { %625 = vmatpush3.bf16.msra.mxu0 %v670_v45 }
 0x13d   :  { %v566_v35 = vpop.f32.mrb[0].mxu0 }
 0x13e   :  { %v567_v37 = vpop.f32.mrb[1].mxu0 }
 0x13f   :  { %v568_v38 = vadd.f32 %v567_v37, %v566_v35  ;;  %v569_v39 = vpop.f32.mrb[2].mxu0 }
 0x140   :  { %v570_v40 = vpop.f32.mrb[3].mxu0 }
 0x141   :  { %v255_v41 = vadd.f32 %v568_v38, %v515_v36 }
 0x143   :  { %v260_v42 = vmax.f32 %v255_v41, 0.0 }
 0x145   :  { %v261_v43 = vpack.c.bf16 %v260_v42, %v260_v42 }
 0x147   :  { %607 = vmatmul.mubr.bf16.vlgmr.msra.gmra.mrb[0].mxu1 %v261_v43 }
 0x21a   :  { %v367_v47 = vpop.f32.mrb[0].mxu1 }
 0x21b   :  { %v368_v48 = vadd.f32 %v532_v46, %v367_v47  ;;  %v608_v49 = vpop.f32.mrb[1].mxu1 }
 0x21c   :  { %v370_v50 = vpop.f32.mrb[2].mxu1 }
 0x21d   :  { %v373_v51 = vmax.f32 %v368_v48, 0.0  ;;  %v609_v52 = vpop.f32.mrb[3].mxu1 }
 0x21f   :  { %v374_v53 = vpack.c.bf16 %v373_v51, %v373_v51 }
 0x221   :  { %627 = vmatmul.mubr.bf16.vlgmr.msra.gmra.mrb[4].mxu0 %v374_v53 }
 0x2f4   :  { %v480_v55 = vpop.f32.mrb[4].mxu0 }
 0x2f5   :  { %v481_v56 = vadd.f32 %v541_v54, %v480_v55  ;;  %v628_v57 = vpop.f32.mrb[5].mxu0 }
 0x2f6   :  { %v483_v58 = vpop.f32.mrb[6].mxu0 }
 0x2f7   :  { %486 = vmax.xlane.f32.xlu0 %v481_v56  ;;  %v629_v59 = vpop.f32.mrb[7].mxu0 }
 0x384   :  { %v487_v60 = vpop.xlane.xlu0 %486 }
 0x385   :  { %v488_v61 = vsub.f32 %v481_v56, %v487_v60 }
 0x387   :  { %v489_v62 = vmul.f32 1.442695, %v488_v61 }
 0x389   :  { %671 = vpow2.f32 %v489_v62 }
 0x393   :  { %v672_v63 = vpop.eup %671 }
 0x394   :  { %491 = vadd.xlane.f32.xlu0 %v672_v63 }
 0x421   :  { %v492_v0 = vpop.xlane.xlu0 %491 }
 0x422   :  { %673 = vlog2.f32 %v492_v0 }
 0x42c   :  { %v674_v1 = vpop.eup %673 }
 0x42d   :  { %v494_v2 = vmul.f32 0.6931472, %v674_v1 }
 0x42f   :  { %v495_v3 = vsub.f32 %v488_v61, %v494_v2 }
 0x431   :  { %497 = vst.msk [vmem:[#allocation10] sm:$0xff] %vm496_vm1, %v495_v3 }
 0x432   :  { %774 = shalt.err (!%p771_p8)
}
 0x433   :  { %s775_s8 = scalar_lea.hbm %s945_s7, 128 }
 0x434   :  { %p776_p9 = scmp.ne.s32.totalorder %s945_s7, %s775_s8  ;;  %p779_p10 = scmp.lt.u32.totalorder %s775_s8, %s945_s7 }
 0x436   :  { %p781_p11 = pnand %p779_p10, %p776_p9 }
 0x438   :  { %784 = shalt.err (!%p781_p11)
}
 0x439   :  { %507 = dma.vmem_to_hbm [thread:$0]  %s505_s28, 128, %s945_s7, [#allocation4]  }
 0x43a   :  { %791 = dma.done.wait [#allocation4], 128  }
 0x43b   :  { %792 = vsyncadd [#allocation4], 4294967168 }
 0x43c   :  { %511 = vsyncpa [#allocation3], 1 }
 0x43d   :  { %512 = vsyncpa [#allocation6], 1 }
 0x43e   :  { %513 = vsyncpa [#allocation9], 1 }
 0x43f   :  { %514 = vsyncpa [#allocation4], 1 }

</bundles_post_ra>
